<compile_context>
chip_gen: v7x
topology: tpu7x:2x2x1
jax: 0.10.0
libtpu: 0.0.40
codegen_flags: <defaults>
</compile_context>

<pallas_src>
import math

import jax
import jax.numpy as jnp
from jax.experimental import pallas as pl
from jax.experimental.pallas import tpu as pltpu


def afm_kernel(first_ref, fm2t_ref, selLR_ref, wbd_ref, wb_ref,
               hsel_ref, hb_ref, pmat_ref, out_ref):
    """One batch tile.  Every activation is (rows, TB): batch on the lane axis."""
    f32 = jnp.float32
    fm2t = fm2t_ref[...]                                                # (F*E, TB) bf16

    # Pair tensor for all A = F*(F-1)/2 pairs.  selLR stacks the left/right
    # selection matrices so ONE MXU pass produces both factors.
    lr = jnp.dot(selLR_ref[...], fm2t, preferred_element_type=f32)      # (2*A*E, TB)
    ae = lr.shape[0] // 2
    vt = lr[:ae] * lr[ae:]                                              # (A*E, TB) f32
    vt_b = vt.astype(fm2t.dtype)

    # Attention MLP over all pairs at once (block-diag kron(I_A, W));
    # W.bias + b are pre-added in the wrapper.
    s = jnp.dot(wbd_ref[...], vt_b, preferred_element_type=f32) + wb_ref[...]   # (A*K, TB)
    s = jnp.maximum(s, 0.0)
    logits = (jnp.dot(hsel_ref[...], s.astype(fm2t.dtype),
                      preferred_element_type=f32) + hb_ref[...])                # (A, TB)

    # Softmax over the pair axis (sublanes).  Exact divide on a (1, TB) row is
    # essentially free, so no approx reciprocal.
    m = jnp.max(logits, axis=0, keepdims=True)
    ex = jnp.exp(logits - m)
    w = ex / jnp.sum(ex, axis=0, keepdims=True)                         # (A, TB)

    # p is linear, so p(sum_a w_a v_a) == sum_a w_a * (p . v_a).
    q = jnp.dot(pmat_ref[...], vt_b, preferred_element_type=f32)        # (A, TB)
    proj = jnp.sum(w * q, axis=0, keepdims=True)                        # (1, TB)

    # first_ref already holds sum_f fm1 + p.bias + global bias (wrapper-fused).
    out_ref[...] = jax.nn.sigmoid(first_ref[...] + proj)                # (1, TB)


def _ceil_to(v, m):
    return ((v + m - 1) // m) * m


def afm_forward(x, params, field_size, embedding_size, tb=8192):
    """AFM forward.  x: (B, F) int32 indices into the shared embedding tables."""
    F, E = field_size, embedding_size
    A = F * (F - 1) // 2                          # number of field pairs
    K = params["W_w"].shape[0]                    # attention-MLP hidden size
    assert params["W_w"].shape == (K, E)
    assert params["h_w"].shape == (1, K), "h must map the attention hidden dim to 1"
    assert params["W_b"].shape == (K,) and params["b"].shape == (K,)
    B = x.shape[0]
    bf16 = jnp.bfloat16

    # ---- batch tile choice ---------------------------------------------------
    # Lane-dense, large enough to amortise the ~0.35us per-grid-step pipeline
    # cost, clamped to what the batch needs, and (when the batch allows) split
    # into >= 2 tiles so the "parallel" axis shards across v7x's two TensorCores.
    b128 = _ceil_to(B, 128)
    tb = max(128, min(tb, _ceil_to(b128 // 2, 128) if b128 >= 256 else b128))
    ntiles = pl.cdiv(b128, tb)
    bpad = ntiles * tb

    # ---- embedding gathers (XLA glue), straight into the kernel layout --------
    # Pad the int32 indices (cheap) instead of the gathered activations; gather
    # the second-order stream directly (E, F, bpad)-major so no big HBM
    # transpose/pad is needed, and cast the (tiny) table to bf16 once so the
    # kernel's dominant HBM read is halved.
    x_pad = jnp.pad(x, ((0, bpad - B), (0, 0)))                         # (bpad, F)
    table2_t = params["fm_second_w"].astype(bf16).T                     # (E, n_feat)
    fm2t = table2_t[:, x_pad.T].reshape(E * F, bpad)                    # rows: e*F + f
    # First-order term fully reduced in the wrapper: one f32 row total.
    fm1_sum = jnp.sum(params["fm_first_w"][x, 0].astype(jnp.float32), axis=1)   # (B,)
    first = jnp.pad(fm1_sum + params["p_b"][0] + params["bias"][0],
                    (0, bpad - B)).reshape(1, bpad)                     # (1, bpad)

    # ---- constant matrices (built once at trace time, grid-invariant) ---------
    pairs = [(i, j) for i in range(F) for j in range(i + 1, F)]
    rows = jnp.array([i for i, _ in pairs], jnp.int32)
    cols = jnp.array([j for _, j in pairs], jnp.int32)
    eye_f = jnp.eye(F, dtype=jnp.float32)
    eye_e = jnp.eye(E, dtype=jnp.float32)
    eye_a = jnp.eye(A, dtype=jnp.float32)
    selL = jnp.kron(eye_f[rows], eye_e)                                 # (A*E, F*E)
    selR = jnp.kron(eye_f[cols], eye_e)                                 # (A*E, F*E)
    # permute columns to the (e*F + f) order of the gathered fm2t, then stack
    # left/right so the kernel does ONE matmul for both pair factors.
    col_perm = jnp.arange(F * E).reshape(F, E).T.reshape(-1)            # [e*F+f] -> f*E+e
    selLR = jnp.concatenate([selL[:, col_perm], selR[:, col_perm]], 0).astype(bf16)
    wbd = jnp.kron(eye_a, params["W_w"].astype(jnp.float32)).astype(bf16)       # (A*K, A*E)
    wb = jnp.tile((params["W_b"] + params["b"]).astype(jnp.float32).reshape(K, 1),
                  (A, 1))                                               # (A*K, 1) f32
    hsel = jnp.kron(eye_a, params["h_w"].astype(jnp.float32).reshape(1, K)).astype(bf16)
    hb = jnp.full((A, 1), params["h_b"][0], jnp.float32)                # (A, 1)
    pmat = jnp.kron(eye_a, params["p_w"].astype(jnp.float32).reshape(1, E)).astype(bf16)

    tile_map = lambda i: (0, i)       # batch-tiled operands
    const_map = lambda i: (0, 0)      # grid-invariant parameters (fetched once)

    out = pl.pallas_call(
        afm_kernel,
        out_shape=jax.ShapeDtypeStruct((1, bpad), jnp.float32),
        grid_spec=pltpu.PrefetchScalarGridSpec(
            num_scalar_prefetch=0,
            grid=(ntiles,),
            in_specs=[
                pl.BlockSpec((1, tb), tile_map),               # first-order row (f32)
                pl.BlockSpec((F * E, tb), tile_map),           # fm2t (bf16)
                pl.BlockSpec((2 * A * E, F * E), const_map),   # [selL; selR] (bf16)
                pl.BlockSpec((A * K, A * E), const_map),       # kron(I_A, W) (bf16)
                pl.BlockSpec((A * K, 1), const_map),           # W.bias + b (f32)
                pl.BlockSpec((A, A * K), const_map),           # kron(I_A, h) (bf16)
                pl.BlockSpec((A, 1), const_map),               # h.bias (f32)
                pl.BlockSpec((A, A * E), const_map),           # kron(I_A, p) (bf16)
            ],
            out_specs=pl.BlockSpec((1, tb), tile_map),
        ),
        compiler_params=pltpu.CompilerParams(
            dimension_semantics=("parallel",),                 # batch tiles independent
            vmem_limit_bytes=48 * 1024 * 1024,                 # headroom for big tiles
        ),
    )(first, fm2t, selLR, wbd, wb, hsel, hb, pmat)

    return out[0, :B]                                                   # (B,)


def afm_reference(x, params):
    """Pure-JAX reference mirroring the PyTorch forward (f32 throughout)."""
    F = x.shape[1]
    fm1 = params["fm_first_w"][x, 0]
    fm2 = params["fm_second_w"][x]
    rows = [i for i in range(F) for j in range(i + 1, F)]
    cols = [j for i in range(F) for j in range(i + 1, F)]
    v = fm2[:, rows, :] * fm2[:, cols, :]                                   # (B, A, E)
    s = jnp.einsum("bae,ke->bak", v, params["W_w"]) + params["W_b"] + params["b"]
    s = jnp.maximum(s, 0.0)
    logits = jnp.einsum("bak,k->ba", s, params["h_w"][0]) + params["h_b"][0]
    w = jax.nn.softmax(logits, axis=1)
    atm = jnp.einsum("ba,bae->be", w, v)
    proj = atm @ params["p_w"][0] + params["p_b"][0]
    total = jnp.sum(fm1, axis=1) + proj + params["bias"][0]
    return jax.nn.sigmoid(total)


def init_params(key, feat_sizes, field_size, embedding_size):
    A = field_size * (field_size - 1) // 2
    n_feat = sum(feat_sizes)
    stdv = math.sqrt(1.0 / len(feat_sizes))
    ks = jax.random.split(key, 10)
    lin_e = 1.0 / math.sqrt(embedding_size)
    lin_a = 1.0 / math.sqrt(A)
    return {
        "bias": jax.random.normal(ks[0], (1,), jnp.float32),
        "fm_first_w": stdv * jax.random.normal(ks[1], (n_feat, 1), jnp.float32),
        "fm_second_w": jax.random.normal(ks[2], (n_feat, embedding_size), jnp.float32),
        "W_w": jax.random.uniform(ks[3], (A, embedding_size), jnp.float32, -lin_e, lin_e),
        "W_b": jax.random.uniform(ks[4], (A,), jnp.float32, -lin_e, lin_e),
        "b": jax.random.normal(ks[5], (A,), jnp.float32),
        "h_w": jax.random.uniform(ks[6], (1, A), jnp.float32, -lin_a, lin_a),
        "h_b": jax.random.uniform(ks[7], (1,), jnp.float32, -lin_a, lin_a),
        "p_w": jax.random.uniform(ks[8], (1, embedding_size), jnp.float32, -lin_e, lin_e),
        "p_b": jax.random.uniform(ks[9], (1,), jnp.float32, -lin_e, lin_e),
    }


if __name__ == "__main__":
    key = jax.random.PRNGKey(0)
    feat_sizes = [10, 20, 30, 40]
    field_size = len(feat_sizes)          # F = 4  -> A = 6
    embedding_size = 4
    batch = 2

    k_par, k_x = jax.random.split(key)
    params = init_params(k_par, feat_sizes, field_size, embedding_size)

    # indices: one feature per field, offset into the concatenated embedding table
    offsets = jnp.array([0] + list(jnp.cumsum(jnp.array(feat_sizes))[:-1]), jnp.int32)
    xk = jax.random.split(k_x, field_size)
    cols = [jax.random.randint(xk[f], (batch,), 0, feat_sizes[f], jnp.int32) + offsets[f]
            for f in range(field_size)]
    x = jnp.stack(cols, axis=1)           # (B, F) int32

    out = afm_forward(x, params, field_size, embedding_size)
    out = jax.block_until_ready(out)

    ref = afm_reference(x, params)
    assert out.shape == (batch,)
    # bf16 embeddings / constant operands in the kernel -> loosened tolerance
    assert jnp.allclose(out, ref, atol=2e-2, rtol=2e-2), (out, ref)

    print("KERNEL_OK")
</pallas_src>

<mosaic_0001>
module attributes {stable_mosaic.version = 11 : i64} {
  func.func @afm_kernel(%arg0: i32, %arg1: memref<1x128xf32, #tpu.memory_space<vmem>>, %arg2: memref<16x128xbf16, #tpu.memory_space<vmem>>, %arg3: memref<48x16xbf16, #tpu.memory_space<vmem>>, %arg4: memref<36x24xbf16, #tpu.memory_space<vmem>>, %arg5: memref<36x1xf32, #tpu.memory_space<vmem>>, %arg6: memref<6x36xbf16, #tpu.memory_space<vmem>>, %arg7: memref<6x1xf32, #tpu.memory_space<vmem>>, %arg8: memref<6x24xbf16, #tpu.memory_space<vmem>>, %arg9: memref<1x128xf32, #tpu.memory_space<vmem>>) attributes {dimension_semantics = [#tpu.dimension_semantics<parallel>], iteration_bounds = array<i64: 1>, scalar_prefetch = 0 : i64, scratch_operands = 0 : i64, tpu.core_type = #tpu.core_type<tc>, window_params = [{transform_indices = @transform_0, window_bounds = array<i64: 1, 128>}, {transform_indices = @transform_1, window_bounds = array<i64: 16, 128>}, {pipeline_mode = #tpu.pipeline_mode<synchronous>, transform_indices = @transform_2, window_bounds = array<i64: 48, 16>}, {pipeline_mode = #tpu.pipeline_mode<synchronous>, transform_indices = @transform_3, window_bounds = array<i64: 36, 24>}, {pipeline_mode = #tpu.pipeline_mode<synchronous>, transform_indices = @transform_4, window_bounds = array<i64: 36, 1>}, {pipeline_mode = #tpu.pipeline_mode<synchronous>, transform_indices = @transform_5, window_bounds = array<i64: 6, 36>}, {pipeline_mode = #tpu.pipeline_mode<synchronous>, transform_indices = @transform_6, window_bounds = array<i64: 6, 1>}, {pipeline_mode = #tpu.pipeline_mode<synchronous>, transform_indices = @transform_7, window_bounds = array<i64: 6, 24>}, {transform_indices = @transform_8, window_bounds = array<i64: 1, 128>}]} {
    %c0 = arith.constant 0 : index
    %c0_0 = arith.constant 0 : index
    %0 = vector.load %arg2[%c0, %c0_0] : memref<16x128xbf16, #tpu.memory_space<vmem>>, vector<16x128xbf16>
    %c0_1 = arith.constant 0 : index
    %c0_2 = arith.constant 0 : index
    %1 = vector.load %arg3[%c0_1, %c0_2] : memref<48x16xbf16, #tpu.memory_space<vmem>>, vector<48x16xbf16>
    %cst = arith.constant dense<0.000000e+00> : vector<48x128xf32>
    %2 = tpu.matmul %1, %0, %cst {dimension_numbers = #tpu.dot_dimension_numbers<[1], [0], [0], [1], [0, 0, 1, 1], [], []>} : vector<48x16xbf16>, vector<16x128xbf16>, vector<48x128xf32> -> vector<48x128xf32>
    %3 = vector.extract_strided_slice %2 {offsets = [0, 0], sizes = [24, 128], strides = [1, 1]} : vector<48x128xf32> to vector<24x128xf32>
    %4 = vector.extract_strided_slice %2 {offsets = [24, 0], sizes = [24, 128], strides = [1, 1]} : vector<48x128xf32> to vector<24x128xf32>
    %5 = arith.mulf %3, %4 : vector<24x128xf32>
    %6 = arith.truncf %5 : vector<24x128xf32> to vector<24x128xbf16>
    %c0_3 = arith.constant 0 : index
    %c0_4 = arith.constant 0 : index
    %7 = vector.load %arg4[%c0_3, %c0_4] : memref<36x24xbf16, #tpu.memory_space<vmem>>, vector<36x24xbf16>
    %cst_5 = arith.constant dense<0.000000e+00> : vector<36x128xf32>
    %8 = tpu.matmul %7, %6, %cst_5 {dimension_numbers = #tpu.dot_dimension_numbers<[1], [0], [0], [1], [0, 0, 1, 1], [], []>} : vector<36x24xbf16>, vector<24x128xbf16>, vector<36x128xf32> -> vector<36x128xf32>
    %c0_6 = arith.constant 0 : index
    %c0_7 = arith.constant 0 : index
    %9 = vector.load %arg5[%c0_6, %c0_7] : memref<36x1xf32, #tpu.memory_space<vmem>>, vector<36x1xf32>
    %10 = vector.broadcast %9 : vector<36x1xf32> to vector<36x128xf32>
    %11 = arith.addf %8, %10 : vector<36x128xf32>
    %cst_8 = arith.constant 0.000000e+00 : f32
    %12 = vector.broadcast %cst_8 : f32 to vector<36x128xf32>
    %13 = arith.maximumf %11, %12 : vector<36x128xf32>
    %c0_9 = arith.constant 0 : index
    %c0_10 = arith.constant 0 : index
    %14 = vector.load %arg6[%c0_9, %c0_10] : memref<6x36xbf16, #tpu.memory_space<vmem>>, vector<6x36xbf16>
    %15 = arith.truncf %13 : vector<36x128xf32> to vector<36x128xbf16>
    %cst_11 = arith.constant dense<0.000000e+00> : vector<6x128xf32>
    %16 = tpu.matmul %14, %15, %cst_11 {dimension_numbers = #tpu.dot_dimension_numbers<[1], [0], [0], [1], [0, 0, 1, 1], [], []>} : vector<6x36xbf16>, vector<36x128xbf16>, vector<6x128xf32> -> vector<6x128xf32>
    %c0_12 = arith.constant 0 : index
    %c0_13 = arith.constant 0 : index
    %17 = vector.load %arg7[%c0_12, %c0_13] : memref<6x1xf32, #tpu.memory_space<vmem>>, vector<6x1xf32>
    %18 = vector.broadcast %17 : vector<6x1xf32> to vector<6x128xf32>
    %19 = arith.addf %16, %18 : vector<6x128xf32>
    %cst_14 = arith.constant dense<0xFF800000> : vector<128xf32>
    %20 = vector.multi_reduction <maximumf>, %19, %cst_14 [0] : vector<6x128xf32> to vector<128xf32>
    %21 = vector.shape_cast %20 : vector<128xf32> to vector<1x128xf32>
    %22 = vector.broadcast %21 : vector<1x128xf32> to vector<6x128xf32>
    %23 = arith.subf %19, %22 : vector<6x128xf32>
    %24 = math.exp %23 : vector<6x128xf32>
    %cst_15 = arith.constant dense<0.000000e+00> : vector<128xf32>
    %25 = vector.multi_reduction <add>, %24, %cst_15 [0] : vector<6x128xf32> to vector<128xf32>
    %26 = vector.shape_cast %25 : vector<128xf32> to vector<1x128xf32>
    %27 = vector.broadcast %26 : vector<1x128xf32> to vector<6x128xf32>
    %28 = arith.divf %24, %27 : vector<6x128xf32>
    %c0_16 = arith.constant 0 : index
    %c0_17 = arith.constant 0 : index
    %29 = vector.load %arg8[%c0_16, %c0_17] : memref<6x24xbf16, #tpu.memory_space<vmem>>, vector<6x24xbf16>
    %cst_18 = arith.constant dense<0.000000e+00> : vector<6x128xf32>
    %30 = tpu.matmul %29, %6, %cst_18 {dimension_numbers = #tpu.dot_dimension_numbers<[1], [0], [0], [1], [0, 0, 1, 1], [], []>} : vector<6x24xbf16>, vector<24x128xbf16>, vector<6x128xf32> -> vector<6x128xf32>
    %31 = arith.mulf %28, %30 : vector<6x128xf32>
    %cst_19 = arith.constant dense<0.000000e+00> : vector<128xf32>
    %32 = vector.multi_reduction <add>, %31, %cst_19 [0] : vector<6x128xf32> to vector<128xf32>
    %33 = vector.shape_cast %32 : vector<128xf32> to vector<1x128xf32>
    %c0_20 = arith.constant 0 : index
    %c0_21 = arith.constant 0 : index
    %34 = vector.load %arg1[%c0_20, %c0_21] : memref<1x128xf32, #tpu.memory_space<vmem>>, vector<1x128xf32>
    %35 = arith.addf %34, %33 : vector<1x128xf32>
    %36 = arith.negf %35 : vector<1x128xf32>
    %37 = math.exp %36 : vector<1x128xf32>
    %cst_22 = arith.constant 1.000000e+00 : f32
    %38 = vector.broadcast %cst_22 : f32 to vector<1x128xf32>
    %39 = arith.addf %38, %37 : vector<1x128xf32>
    %40 = arith.divf %38, %39 : vector<1x128xf32>
    %c0_23 = arith.constant 0 : index
    %c0_24 = arith.constant 0 : index
    %41 = vector.load %arg9[%c0_23, %c0_24] : memref<1x128xf32, #tpu.memory_space<vmem>>, vector<1x128xf32>
    tpu.vector_store %arg9[%c0_23, %c0_24], %40 {strides = array<i32>} : memref<1x128xf32, #tpu.memory_space<vmem>>, vector<1x128xf32>,
    return
  }
  func.func @transform_0(%arg0: i32) -> (i32, i32) {
    %c0_i32 = arith.constant 0 : i32
    %c0_i32_0 = arith.constant 0 : i32
    return %c0_i32, %arg0 : i32, i32
  }
  func.func @transform_1(%arg0: i32) -> (i32, i32) {
    %c0_i32 = arith.constant 0 : i32
    %c0_i32_0 = arith.constant 0 : i32
    return %c0_i32, %arg0 : i32, i32
  }
  func.func @transform_2(%arg0: i32) -> (i32, i32) {
    %c0_i32 = arith.constant 0 : i32
    %c0_i32_0 = arith.constant 0 : i32
    %c0_i32_1 = arith.constant 0 : i32
    return %c0_i32, %c0_i32_0 : i32, i32
  }
  func.func @transform_3(%arg0: i32) -> (i32, i32) {
    %c0_i32 = arith.constant 0 : i32
    %c0_i32_0 = arith.constant 0 : i32
    %c0_i32_1 = arith.constant 0 : i32
    return %c0_i32, %c0_i32_0 : i32, i32
  }
  func.func @transform_4(%arg0: i32) -> (i32, i32) {
    %c0_i32 = arith.constant 0 : i32
    %c0_i32_0 = arith.constant 0 : i32
    %c0_i32_1 = arith.constant 0 : i32
    return %c0_i32, %c0_i32_0 : i32, i32
  }
  func.func @transform_5(%arg0: i32) -> (i32, i32) {
    %c0_i32 = arith.constant 0 : i32
    %c0_i32_0 = arith.constant 0 : i32
    %c0_i32_1 = arith.constant 0 : i32
    return %c0_i32, %c0_i32_0 : i32, i32
  }
  func.func @transform_6(%arg0: i32) -> (i32, i32) {
    %c0_i32 = arith.constant 0 : i32
    %c0_i32_0 = arith.constant 0 : i32
    %c0_i32_1 = arith.constant 0 : i32
    return %c0_i32, %c0_i32_0 : i32, i32
  }
  func.func @transform_7(%arg0: i32) -> (i32, i32) {
    %c0_i32 = arith.constant 0 : i32
    %c0_i32_0 = arith.constant 0 : i32
    %c0_i32_1 = arith.constant 0 : i32
    return %c0_i32, %c0_i32_0 : i32, i32
  }
  func.func @transform_8(%arg0: i32) -> (i32, i32) {
    %c0_i32 = arith.constant 0 : i32
    %c0_i32_0 = arith.constant 0 : i32
    return %c0_i32, %arg0 : i32, i32
  }
}

</mosaic_0001>

<bundles_post_ra>
// kernel: tpu_custom_call.1
= control target key start
LH: loop header
LB: loop body
LE: loop exit
PB: predicated region body
PF: predicated region fallthrough
CT: control target
= control target key end

     0   :  { %v533_v1 = vmov 0.0   ;;  %vm534_vm0 = vmmov 0   ;;  %vm60_vm1 = vcmask 130048   ;;  %s669_s0 = inlined_call_operand.vmem [shape: f32[1,128], index: 0, kind: input, shape index: {}]   ;;  %s670_s1 = inlined_call_operand.vmem [shape: bf16[16,128], index: 1, kind: input, shape index: {}]   ;;  %s671_s2 = inlined_call_operand.vmem [shape: bf16[48,16], index: 2, kind: input, shape index: {}]   ;;  %s672_s3 = inlined_call_operand.vmem [shape: bf16[36,24], index: 3, kind: input, shape index: {}]   ;;  %s673_s4 = inlined_call_operand.vmem [shape: f32[36,1], index: 4, kind: input, shape index: {}]   ;;  %s674_s5 = inlined_call_operand.vmem [shape: bf16[6,36], index: 5, kind: input, shape index: {}]   ;;  %s675_s6 = inlined_call_operand.vmem [shape: f32[6,1], index: 6, kind: input, shape index: {}]   ;;  %s676_s7 = inlined_call_operand.vmem [shape: bf16[6,24], index: 7, kind: input, shape index: {}]   ;;  %s677_s8 = inlined_call_operand.hbm [shape: f32[1,128], index: 8, kind: output, shape index: {}]  }
   0x1   :  { %v494_v0 = vld [vmem:[%s670_s1] sm:$0xff]   ;;  %440 = vmatprep.subr.bf16.mxu0 %v533_v1  ;;  %454 = vmatprep.subr.bf16.mxu1 %v533_v1 }
   0x2   :  { %v495_v2 = vld [vmem:[%s671_s2] sm:$0xff]   ;;  %441 = vmatpush3.bf16.msra.mxu0 %v494_v0  ;;  %442 = vmatprep.mubr.msk.bf16.mxu0 %vm534_vm0, %v533_v1 }
   0x3   :  { %458 = vmatprep.mubr.msk.bf16.mxu1 %vm534_vm0, %v533_v1  ;;  %470 = vmatprep.subr.bf16.mxu0 %v533_v1 }
   0x5   :  { %443 = vmatmul.mubr.msk.bf16.vlgmr.msra.gmra.mrb[0].mxu0 %vm60_vm1, %v495_v2 }
   0x6   :  { %13 = vsyncpa [#allocation3], 0  ;;  %446 = vmatprep.mubr.msk.bf16.mxu0 %vm534_vm0, %v533_v1  ;;  %v496_v3 = vld [vmem:[%s671_s2 + $0x8] sm:$0xff]   ;;  %v497_v4 = vld [vmem:[%s671_s2 + $0x10] sm:$0xff]   ;;  %v535_v7 = vmov 0   ;;  %vm190_vm2 = vcmask 1043456  }
   0x7   :  { %v137_v5 = vld [vmem:[%s673_s4] sm:$0xff]  ;;  %v139_v6 = vld [vmem:[%s673_s4 + $0x10] sm:$0xff]  ;;  %492 = vset.pattern.permute.xlu0 %v535_v7  ;;  %493 = vset.pattern.permute.xlu1 %v535_v7  ;;  %v138_v8 = vld [vmem:[%s673_s4 + $0x8] sm:$0xff]  ;;  %vm180_vm3 = vcmask 195584   ;;  %vm269_vm4 = vcmask 1041408   ;;  %vm265_vm5 = vcmask 293888  }
   0x8   :  { %144 = vperm.xlu0 %492, %v137_v5   ;;  %154 = vperm.xlu1 %493, %v139_v6   ;;  %v140_v9 = vld [vmem:[%s673_s4 + $0x18] sm:$0xff]  ;;  %v141_v10 = vld [vmem:[%s673_s4 + $0x20] sm:$0xf]  ;;  %v499_v31 = vld [vmem:[%s672_s3 + $0x8] sm:$0xff]   ;;  %vm313_vm6 = vcmask 1045504   ;;  %s536_s30 = smov [#allocation2]  }
   0x9   :  { %v259_v11 = vld [vmem:[%s675_s6] sm:$0x3f]  ;;  %v500_v32 = vld [vmem:[%s672_s3 + $0x10] ss:$0 sps:$4 sm:$0x33]   ;;  %s400_s1 = sshll.u32 %s536_s30, 4  ;;  %s401_s1 = int_to_ptr.vmem [resolvable:$true] %s400_s1 }
   0xa   :  { %v498_v30 = vld [vmem:[%s672_s3] sm:$0xff]   ;;  %s509_s9 = scalar_lea.vmem %s401_s1, 16  ;;  %s513_s10 = scalar_lea.vmem %s401_s1, 32 }
   0xb   :  { %v333_v33 = vld [vmem:[%s676_s7] sm:$0x7]  ;;  %p510_p0 = scmp.ne.s32.totalorder %s401_s1, %s509_s9  ;;  %p514_p1 = scmp.lt.s32.totalorder %s401_s1, %s401_s1 }
   0xc   :  { %149 = vperm.xlu0 %492, %v138_v8   ;;  %159 = vperm.xlu1 %493, %v140_v9   ;;  %v255_v2 = vld [vmem:[%s674_s5] sm:$0x7]  ;;  %p515_p2 = scmp.lt.s32.totalorder %s513_s10, %s509_s9 }
   0xd   :  { %447 = vmatmul.mubr.msk.bf16.gmra.mrb[4].mxu0 %vm60_vm1, %v496_v3 }
   0xe   :  { %450 = vmatprep.mubr.msk.bf16.mxu0 %vm534_vm0, %v533_v1  ;;  %p516_p3 = por %p515_p2, %p514_p1 }
  0x10   :  { %164 = vperm.xlu0 %492, %v141_v10   ;;  %262 = vperm.xlu1 %493, %v259_v11   ;;  %p517_p4 = pnand %p516_p3, %p510_p0 }
  0x15   :  { %451 = vmatmul.mubr.msk.bf16.gmra.mrb[8].mxu0 %vm60_vm1, %v497_v4 }
  0x16   :  { %476 = vmatprep.mubr.msk.bf16.mxu0 %vm534_vm0, %v533_v1 }
  0x87   :  { %v145_v34 = vpop.permute.xlu0 %144  ;;  %v155_v42 = vpop.permute.xlu1 %154 }
  0x8b   :  { %v150_v35 = vpop.permute.xlu0 %149  ;;  %v160_v49 = vpop.permute.xlu1 %159 }
  0x8f   :  { %v165_v56 = vpop.permute.xlu0 %164  ;;  %v263_v7 = vpop.permute.xlu1 %262 }
  0xd8   :  { %v104_v12 = vpop.f32.mrb[0].mxu0 }
  0xd9   :  { %v444_v13 = vpop.f32.mrb[1].mxu0 }
  0xda   :  { %v107_v14 = vpop.f32.mrb[2].mxu0 }
  0xdb   :  { %v445_v15 = vpop.f32.mrb[3].mxu0 }
  0xe0   :  { %v112_v16 = vpop.f32.mrb[4].mxu0 }
  0xe1   :  { %v448_v17 = vpop.f32.mrb[5].mxu0 }
  0xe2   :  { %v115_v18 = vpop.f32.mrb[6].mxu0 }
  0xe3   :  { %v127_v19 = vmul.f32 %v115_v18, %v104_v12  ;;  %v449_v20 = vpop.f32.mrb[7].mxu0 }
  0xe8   :  { %v120_v21 = vpop.f32.mrb[8].mxu0 }
  0xe9   :  { %v128_v22 = vmul.f32 %v120_v21, %v107_v14  ;;  %v452_v23 = vpop.f32.mrb[9].mxu0 }
  0xea   :  { %v123_v24 = vpop.f32.mrb[10].mxu0 }
  0xeb   :  { %v129_v25 = vmul.f32 %v123_v24, %v112_v16  ;;  %v453_v26 = vpop.f32.mrb[11].mxu0  ;;  %v130_v27 = vpack.c.bf16 %v128_v22, %v127_v19 }
  0xed   :  { %v131_v28 = vpack.c.bf16 %v129_v25, %v129_v25  ;;  %455 = vmatpush3.bf16.msra.mxu1 %v130_v27 }
  0xee   :  { %456 = vmatprep.subr.bf16.mxu1 %v533_v1 }
  0xef   :  { %v192_v29 = vsel %vm190_vm2, %v131_v28, 0 }
  0xf1   :  { %457 = vmatpush3.bf16.msra.mxu1 %v192_v29 }
  0xf2   :  { %480 = vmatprep.subr.bf16.mxu1 %v533_v1 }
  0xf4   :  { %459 = vmatmul.mubr.msk.bf16.vlgmr.msra.gmra.mrb[0].mxu1 %vm180_vm3, %v498_v30 }
  0xf5   :  { %481 = vmatpush3.bf16.msra.mxu1 %v130_v27  ;;  %462 = vmatprep.mubr.msk.bf16.mxu1 %vm534_vm0, %v533_v1 }
  0xf6   :  { %482 = vmatprep.subr.bf16.mxu1 %v533_v1 }
  0xf9   :  { %483 = vmatpush3.bf16.msra.mxu1 %v192_v29 }
  0xfc   :  { %463 = vmatmul.mubr.msk.bf16.gmra.mrb[4].mxu1 %vm180_vm3, %v499_v31 }
  0xfd   :  { %466 = vmatprep.mubr.msk.bf16.mxu1 %vm534_vm0, %v533_v1 }
 0x104   :  { %467 = vmatmul.mubr.msk.bf16.gmra.mrb[8].mxu1 %vm180_vm3, %v500_v32 }
 0x105   :  { %484 = vmatprep.mubr.msk.bf16.mxu1 %vm534_vm0, %v533_v1 }
 0x10c   :  { %485 = vmatmul.mubr.msk.bf16.vlgmr.msra.gmra.mrb[12].mxu1 %vm180_vm3, %v333_v33 }
 0x1c7   :  { %v228_v36 = vpop.f32.mrb[0].mxu1 }
 0x1c8   :  { %v229_v37 = vadd.f32 %v228_v36, %v145_v34  ;;  %v460_v38 = vpop.f32.mrb[1].mxu1 }
 0x1c9   :  { %v231_v39 = vpop.f32.mrb[2].mxu1  ;;  %v385_v38 = vld [vmem:[%s669_s0] sm:$0x1] }
 0x1ca   :  { %v232_v40 = vadd.f32 %v231_v39, %v150_v35  ;;  %v461_v41 = vpop.f32.mrb[3].mxu1  ;;  %v250_v43 = vmax.f32 %v229_v37, 0.0 }
 0x1cc   :  { %v251_v44 = vmax.f32 %v232_v40, 0.0 }
 0x1ce   :  { %v256_v45 = vpack.c.bf16 %v251_v44, %v250_v43 }
 0x1cf   :  { %v236_v46 = vpop.f32.mrb[4].mxu1 }
 0x1d0   :  { %v237_v47 = vadd.f32 %v236_v46, %v155_v42  ;;  %v464_v48 = vpop.f32.mrb[5].mxu1  ;;  %471 = vmatpush3.bf16.msra.mxu0 %v256_v45 }
 0x1d1   :  { %v239_v50 = vpop.f32.mrb[6].mxu1  ;;  %472 = vmatprep.subr.bf16.mxu0 %v533_v1 }
 0x1d2   :  { %v240_v51 = vadd.f32 %v239_v50, %v160_v49  ;;  %v465_v52 = vpop.f32.mrb[7].mxu1  ;;  %v252_v53 = vmax.f32 %v237_v47, 0.0 }
 0x1d4   :  { %v253_v54 = vmax.f32 %v240_v51, 0.0 }
 0x1d6   :  { %v257_v55 = vpack.c.bf16 %v253_v54, %v252_v53 }
 0x1d7   :  { %v244_v57 = vpop.f32.mrb[8].mxu1 }
 0x1d8   :  { %v245_v58 = vadd.f32 %v244_v57, %v165_v56  ;;  %v468_v59 = vpop.f32.mrb[9].mxu1  ;;  %473 = vmatpush3.bf16.msra.mxu0 %v257_v55 }
 0x1d9   :  { %v247_v60 = vpop.f32.mrb[10].mxu1  ;;  %474 = vmatprep.subr.bf16.mxu0 %v533_v1 }
 0x1da   :  { %v254_v61 = vmax.f32 %v245_v58, 0.0  ;;  %v469_v62 = vpop.f32.mrb[11].mxu1 }
 0x1dc   :  { %v258_v63 = vpack.c.bf16 %v254_v61, %v254_v61 }
 0x1de   :  { %v271_v0 = vsel %vm269_vm4, %v258_v63, 0 }
 0x1df   :  { %475 = vmatpush3.bf16.msra.mxu0 %v271_v0  ;;  %v371_v3 = vpop.f32.mrb[12].mxu1 }
 0x1e0   :  { %v486_v4 = vpop.f32.mrb[13].mxu1 }
 0x1e1   :  { %v374_v5 = vpop.f32.mrb[14].mxu1 }
 0x1e2   :  { %477 = vmatmul.mubr.msk.bf16.vlgmr.msra.gmra.mrb[12].mxu0 %vm265_vm5, %v255_v2  ;;  %v487_v6 = vpop.f32.mrb[15].mxu1 }
 0x2b5   :  { %v307_v8 = vpop.f32.mrb[12].mxu0 }
 0x2b6   :  { %v308_v1 = vadd.f32 %v307_v8, %v263_v7  ;;  %v478_v9 = vpop.f32.mrb[13].mxu0 }
 0x2b7   :  { %v310_v10 = vpop.f32.mrb[14].mxu0 }
 0x2b8   :  { %v314_v11 = vsel %vm313_vm6, %v308_v1, -inf  ;;  %v479_v12 = vpop.f32.mrb[15].mxu0 }
 0x2b9   :  { %v315_v13 = vrot.slane %v314_v11, 4 }
 0x2bb   :  { %v316_v14 = vmax.f32 %v314_v11, %v315_v13 }
 0x2bd   :  { %v317_v15 = vrot.slane %v316_v14, 2 }
 0x2bf   :  { %v318_v16 = vmax.f32 %v316_v14, %v317_v15 }
 0x2c1   :  { %v319_v17 = vrot.slane %v318_v16, 1 }
 0x2c3   :  { %v320_v18 = vmax.f32 %v318_v16, %v319_v17 }
 0x2c5   :  { %v321_v19 = vsub.f32 %v308_v1, %v320_v18 }
 0x2c7   :  { %v322_v20 = vmul.f32 1.442695, %v321_v19 }
 0x2c9   :  { %501 = vpow2.f32 %v322_v20 }
 0x2d3   :  { %v502_v21 = vpop.eup %501 }
 0x2d4   :  { %v324_v22 = vsel %vm313_vm6, %v502_v21, 0.0 }
 0x2d5   :  { %v325_v23 = vrot.slane %v324_v22, 4 }
 0x2d7   :  { %v326_v24 = vadd.f32 %v325_v23, %v324_v22 }
 0x2d9   :  { %v327_v25 = vrot.slane %v326_v24, 2 }
 0x2db   :  { %v328_v26 = vadd.f32 %v327_v25, %v326_v24 }
 0x2dd   :  { %v329_v27 = vrot.slane %v328_v26, 1 }
 0x2df   :  { %v330_v28 = vadd.f32 %v329_v27, %v328_v26 }
 0x2e1   :  { %503 = vrcp.f32 %v330_v28 }
 0x2eb   :  { %v504_v29 = vpop.eup %503 }
 0x2ec   :  { %v332_v30 = vmul.f32 %v504_v29, %v502_v21 }
 0x2ee   :  { %v377_v31 = vmul.f32 %v371_v3, %v332_v30 }
 0x2f0   :  { %v378_v32 = vsel %vm313_vm6, %v377_v31, 0.0 }
 0x2f1   :  { %v379_v33 = vrot.slane %v378_v32, 4 }
 0x2f3   :  { %v380_v34 = vadd.f32 %v379_v33, %v378_v32 }
 0x2f5   :  { %v381_v35 = vrot.slane %v380_v34, 2 }
 0x2f7   :  { %v382_v36 = vadd.f32 %v381_v35, %v380_v34 }
 0x2f9   :  { %v383_v37 = vrot.slane %v382_v36, 1 }
 0x2fb   :  { %v384_v39 = vadd.f32 %v383_v37, %v382_v36 }
 0x2fd   :  { %v386_v40 = vadd.f32 %v385_v38, %v384_v39 }
 0x2ff   :  { %v423_v41 = vmul.f32 -1.442695, %v386_v40 }
 0x301   :  { %505 = vpow2.f32 %v423_v41 }
 0x30b   :  { %v506_v42 = vpop.eup %505 }
 0x30c   :  { %v390_v43 = vadd.f32 1.0, %v506_v42 }
 0x30e   :  { %507 = vrcp.f32 %v390_v43 }
 0x318   :  { %v508_v44 = vpop.eup %507 }
 0x319   :  { %393 = vst [vmem:[#allocation2] sm:$0x1] %v508_v44 }
 0x31a   :  { %520 = shalt.err (!%p517_p4)
}
 0x31b   :  { %s521_s12 = scalar_lea.hbm %s677_s8, 16 }
 0x31c   :  { %p522_p5 = scmp.ne.s32.totalorder %s677_s8, %s521_s12  ;;  %p525_p6 = scmp.lt.u32.totalorder %s521_s12, %s677_s8 }
 0x31e   :  { %p527_p7 = pnand %p525_p6, %p522_p5 }
 0x320   :  { %530 = shalt.err (!%p527_p7)
}
 0x321   :  { %403 = dma.vmem_to_hbm [thread:$0]  %s401_s1, 16, %s677_s8, [#allocation3]  }
 0x322   :  { %531 = dma.done.wait [#allocation3], 16  }
 0x323   :  { %532 = vsyncadd [#allocation3], 4294967280 }
 0x324   :  { %407 = vsyncpa [#allocation3], 1 }

</bundles_post_ra>
